<compile_context>
chip_gen: v7x
topology: tpu7x:2x2x1
jax: 0.10.0
libtpu: 0.0.40
codegen_flags: <defaults>
</compile_context>

<pallas_src>
import functools

import jax
import jax.numpy as jnp
from jax.experimental import pallas as pl
from jax.experimental.pallas import tpu as pltpu


def _round_up(x, m):
    return ((x + m - 1) // m) * m


def _encoder_image_kernel(x_ref, w_ref, b_ref, o_ref, acc_ref, *,
                          normalize, use_abs, eps):
    """Computes one (tm, E) output tile; img_dim is reduced over grid axis 1."""
    k = pl.program_id(1)

    @pl.when(k == 0)
    def _():
        acc_ref[...] = jnp.zeros_like(acc_ref)

    # MXU matmul; inputs may be bf16, accumulation is always f32.
    acc_ref[...] += jnp.dot(x_ref[...], w_ref[...],
                            preferred_element_type=jnp.float32)

    @pl.when(k == pl.num_programs(1) - 1)
    def _():
        y = acc_ref[...] + b_ref[...]                     # f32 epilogue (VPU)
        if normalize:
            sq = jnp.sum(y * y, axis=-1, keepdims=True)   # pow(2).sum(dim=1, keepdim)
            y = y * jax.lax.rsqrt(sq + eps)               # EUP rsqrt, no f32 divide
        if use_abs:
            y = jnp.abs(y)                                # fused: no extra HBM pass
        o_ref[...] = y.astype(o_ref.dtype)


def encoder_image_precomp(images, weight_t, bias, *, use_abs=False,
                          no_imgnorm=False, tm=256, tk=512,
                          mxu_dtype=jnp.bfloat16, eps=1e-12):
    """EncoderImagePrecomp.forward.

    images:    (B, img_dim) float32
    weight_t:  (img_dim, embed_size)  (PyTorch Linear weight, pre-transposed)
    bias:      (embed_size,)
    tm:        row tile (multiple of 8)
    tk:        img_dim (reduction) tile, multiple of 128
    mxu_dtype: dtype fed to the MXU (bf16 default; jnp.float32 for exact matmul)
    """
    B, D = images.shape
    D_w, E = weight_t.shape
    assert D_w == D, "weight_t must be (img_dim, embed_size)"
    out_dtype = images.dtype

    # Tile sizes clamped to the (padded) problem; tm multiple of 8 (f32 sublane),
    # tk / E padded to multiples of 128 (lane-dense MXU operands & unmasked stores).
    tm_eff = min(_round_up(tm, 8), _round_up(B, 8))
    tk_eff = min(_round_up(tk, 128), _round_up(D, 128))
    B_pad = _round_up(B, tm_eff)
    D_pad = _round_up(D, tk_eff)
    E_pad = _round_up(E, 128)
    nb = B_pad // tm_eff
    nk = D_pad // tk_eff

    in_dtype = out_dtype if mxu_dtype is None else mxu_dtype
    x = jnp.pad(images.astype(in_dtype), ((0, B_pad - B), (0, D_pad - D)))
    w = jnp.pad(weight_t.astype(in_dtype), ((0, D_pad - D), (0, E_pad - E)))
    b2 = jnp.pad(bias.astype(jnp.float32), (0, E_pad - E)).reshape(1, E_pad)

    kernel = functools.partial(_encoder_image_kernel,
                               normalize=not no_imgnorm,
                               use_abs=use_abs, eps=eps)

    # Single-buffer constant operands (index_map never changes) to halve their VMEM.
    w_spec_kwargs = dict(pipeline_mode=pl.Buffered(1)) if nk == 1 else {}

    # Conservative VMEM budget estimate (double-buffered tiles + scratch), with
    # headroom, never below the default scoped limit and capped under v7x physical.
    in_isz = jnp.dtype(in_dtype).itemsize
    out_isz = jnp.dtype(out_dtype).itemsize
    w_bufs = 1 if nk == 1 else 2
    vmem_est = (2 * tm_eff * tk_eff * in_isz            # image tiles
                + w_bufs * tk_eff * E_pad * in_isz      # weight tiles
                + E_pad * 4                             # bias
                + 2 * tm_eff * E_pad * out_isz          # output tiles
                + tm_eff * E_pad * 4)                   # f32 accumulator
    vmem_limit = min(max(32 << 20, int(vmem_est * 3 // 2)), 64 << 20)

    out = pl.pallas_call(
        kernel,
        out_shape=jax.ShapeDtypeStruct((B_pad, E_pad), out_dtype),
        grid_spec=pltpu.PrefetchScalarGridSpec(
            num_scalar_prefetch=0,
            grid=(nb, nk),                                    # reduction axis last
            in_specs=[
                pl.BlockSpec((tm_eff, tk_eff), lambda i, k: (i, k)),   # image tile
                pl.BlockSpec((tk_eff, E_pad), lambda i, k: (k, 0),     # weight K-slice
                             **w_spec_kwargs),
                pl.BlockSpec((1, E_pad), lambda i, k: (0, 0),          # bias (constant)
                             pipeline_mode=pl.Buffered(1)),
            ],
            out_specs=pl.BlockSpec((tm_eff, E_pad), lambda i, k: (i, 0)),
            scratch_shapes=[pltpu.VMEM((tm_eff, E_pad), jnp.float32)],  # f32 accumulator
        ),
        compiler_params=pltpu.CompilerParams(
            # row tiles are independent -> megacore-shardable; K is a reduction.
            dimension_semantics=("parallel", "arbitrary"),
            vmem_limit_bytes=vmem_limit),
    )(x, w, b2)

    return out[:B, :E]


if __name__ == "__main__":
    # Small shapes implied by the module: images (batch, img_dim) -> (batch, embed_size)
    batch, img_dim, embed_size = 8, 32, 16

    key = jax.random.PRNGKey(0)
    k_img, k_w = jax.random.split(key)

    images = jax.random.normal(k_img, (batch, img_dim), dtype=jnp.float32)

    # Deterministic Xavier init matching init_weights():
    # r = sqrt(6) / sqrt(in + out); weight ~ U(-r, r); bias = 0.
    r = jnp.sqrt(6.0) / jnp.sqrt(float(img_dim + embed_size))
    weight = jax.random.uniform(k_w, (embed_size, img_dim),
                                minval=-r, maxval=r, dtype=jnp.float32)
    weight_t = weight.T                       # PyTorch weight is (out, in); store (in, out)
    bias = jnp.zeros((embed_size,), dtype=jnp.float32)

    # Pure-JAX reference (Linear + l2norm over dim=1).
    feats = images @ weight_t + bias
    ref_norm = feats / jnp.sqrt(jnp.sum(feats ** 2, axis=1, keepdims=True))

    # 1) Default perf path: bf16 MXU inputs, f32 accumulate + f32 epilogue.
    out_bf16 = jax.block_until_ready(encoder_image_precomp(images, weight_t, bias))
    assert out_bf16.shape == (batch, embed_size)
    assert jnp.allclose(out_bf16, ref_norm, atol=3e-2, rtol=3e-2), "bf16 path mismatch"

    # 2) Full-precision matmul path: tight check.
    out_f32 = jax.block_until_ready(
        encoder_image_precomp(images, weight_t, bias, mxu_dtype=jnp.float32))
    assert jnp.allclose(out_f32, ref_norm, atol=1e-5, rtol=1e-5), "f32 path mismatch"

    # 3) no_imgnorm=True (skip l2norm) and use_abs=True (fused abs) variants.
    out_nonorm = jax.block_until_ready(
        encoder_image_precomp(images, weight_t, bias, no_imgnorm=True,
                              mxu_dtype=jnp.float32))
    assert jnp.allclose(out_nonorm, feats, atol=1e-5, rtol=1e-5), "no_imgnorm mismatch"

    out_abs = jax.block_until_ready(
        encoder_image_precomp(images, weight_t, bias, use_abs=True,
                              mxu_dtype=jnp.float32))
    assert jnp.allclose(out_abs, jnp.abs(ref_norm), atol=1e-5, rtol=1e-5), "use_abs mismatch"

    # 4) Ragged batch (B not a multiple of the row tile) exercises pad + slice path.
    out7 = jax.block_until_ready(
        encoder_image_precomp(images[:7], weight_t, bias, mxu_dtype=jnp.float32))
    assert out7.shape == (7, embed_size)
    assert jnp.allclose(out7, ref_norm[:7], atol=1e-5, rtol=1e-5), "ragged batch mismatch"

    print("KERNEL_OK")
</pallas_src>

<mosaic_0001>
module attributes {stable_mosaic.version = 11 : i64} {
  func.func @_encoder_image_kernel(%arg0: i32, %arg1: i32, %arg2: memref<8x128xbf16, #tpu.memory_space<vmem>>, %arg3: memref<128x128xbf16, #tpu.memory_space<vmem>>, %arg4: memref<1x128xf32, #tpu.memory_space<vmem>>, %arg5: memref<8x128xf32, #tpu.memory_space<vmem>>, %arg6: memref<8x128xf32, #tpu.memory_space<vmem>>) attributes {dimension_semantics = [#tpu.dimension_semantics<parallel>, #tpu.dimension_semantics<arbitrary>], iteration_bounds = array<i64: 1, 1>, scalar_prefetch = 0 : i64, scratch_operands = 1 : i64, tpu.core_type = #tpu.core_type<tc>, window_params = [{transform_indices = @transform_0, window_bounds = array<i64: 8, 128>}, {pipeline_mode = #tpu.pipeline_mode<synchronous>, transform_indices = @transform_1, window_bounds = array<i64: 128, 128>}, {pipeline_mode = #tpu.pipeline_mode<synchronous>, transform_indices = @transform_2, window_bounds = array<i64: 1, 128>}, {transform_indices = @transform_3, window_bounds = array<i64: 8, 128>}]} {
    %c0_i32 = arith.constant 0 : i32
    %0 = arith.cmpi eq, %arg1, %c0_i32 : i32
    %1 = arith.extui %0 : i1 to i32
    %c0_i32_0 = arith.constant 0 : i32
    %2 = arith.cmpi ne, %1, %c0_i32_0 : i32
    scf.if %2 {
      %cst_10 = arith.constant 0.000000e+00 : f32
      %12 = vector.broadcast %cst_10 : f32 to vector<8x128xf32>
      %c0_11 = arith.constant 0 : index
      %c0_12 = arith.constant 0 : index
      %13 = vector.load %arg6[%c0_11, %c0_12] : memref<8x128xf32, #tpu.memory_space<vmem>>, vector<8x128xf32>
      tpu.vector_store %arg6[%c0_11, %c0_12], %12 {strides = array<i32>} : memref<8x128xf32, #tpu.memory_space<vmem>>, vector<8x128xf32>,
    } else {
    }
    %c0 = arith.constant 0 : index
    %c0_1 = arith.constant 0 : index
    %3 = vector.load %arg6[%c0, %c0_1] : memref<8x128xf32, #tpu.memory_space<vmem>>, vector<8x128xf32>
    %c0_2 = arith.constant 0 : index
    %c0_3 = arith.constant 0 : index
    %4 = vector.load %arg2[%c0_2, %c0_3] : memref<8x128xbf16, #tpu.memory_space<vmem>>, vector<8x128xbf16>
    %c0_4 = arith.constant 0 : index
    %c0_5 = arith.constant 0 : index
    %5 = vector.load %arg3[%c0_4, %c0_5] : memref<128x128xbf16, #tpu.memory_space<vmem>>, vector<128x128xbf16>
    %cst = arith.constant dense<0.000000e+00> : vector<8x128xf32>
    %6 = tpu.matmul %4, %5, %cst {dimension_numbers = #tpu.dot_dimension_numbers<[1], [0], [0], [1], [0, 0, 1, 1], [], []>} : vector<8x128xbf16>, vector<128x128xbf16>, vector<8x128xf32> -> vector<8x128xf32>
    %7 = arith.addf %3, %6 : vector<8x128xf32>
    %c0_6 = arith.constant 0 : index
    %c0_7 = arith.constant 0 : index
    %8 = vector.load %arg6[%c0_6, %c0_7] : memref<8x128xf32, #tpu.memory_space<vmem>>, vector<8x128xf32>
    tpu.vector_store %arg6[%c0_6, %c0_7], %7 {strides = array<i32>} : memref<8x128xf32, #tpu.memory_space<vmem>>, vector<8x128xf32>,
    %c0_i32_8 = arith.constant 0 : i32
    %9 = arith.cmpi eq, %arg1, %c0_i32_8 : i32
    %10 = arith.extui %9 : i1 to i32
    %c0_i32_9 = arith.constant 0 : i32
    %11 = arith.cmpi ne, %10, %c0_i32_9 : i32
    scf.if %11 {
      %c0_10 = arith.constant 0 : index
      %c0_11 = arith.constant 0 : index
      %12 = vector.load %arg6[%c0_10, %c0_11] : memref<8x128xf32, #tpu.memory_space<vmem>>, vector<8x128xf32>
      %c0_12 = arith.constant 0 : index
      %c0_13 = arith.constant 0 : index
      %13 = vector.load %arg4[%c0_12, %c0_13] : memref<1x128xf32, #tpu.memory_space<vmem>>, vector<1x128xf32>
      %14 = vector.broadcast %13 : vector<1x128xf32> to vector<8x128xf32>
      %15 = arith.addf %12, %14 : vector<8x128xf32>
      %16 = arith.mulf %15, %15 : vector<8x128xf32>
      %cst_14 = arith.constant dense<0.000000e+00> : vector<8xf32>
      %17 = vector.multi_reduction <add>, %16, %cst_14 [1] : vector<8x128xf32> to vector<8xf32>
      %18 = vector.shape_cast %17 : vector<8xf32> to vector<8x1xf32>
      %cst_15 = arith.constant 9.99999996E-13 : f32
      %19 = vector.broadcast %cst_15 : f32 to vector<8x1xf32>
      %20 = arith.addf %18, %19 : vector<8x1xf32>
      %21 = math.rsqrt %20 : vector<8x1xf32>
      %22 = vector.broadcast %21 : vector<8x1xf32> to vector<8x128xf32>
      %23 = arith.mulf %15, %22 : vector<8x128xf32>
      %c0_16 = arith.constant 0 : index
      %c0_17 = arith.constant 0 : index
      %24 = vector.load %arg5[%c0_16, %c0_17] : memref<8x128xf32, #tpu.memory_space<vmem>>, vector<8x128xf32>
      tpu.vector_store %arg5[%c0_16, %c0_17], %23 {strides = array<i32>} : memref<8x128xf32, #tpu.memory_space<vmem>>, vector<8x128xf32>,
    } else {
    }
    return
  }
  func.func @transform_0(%arg0: i32, %arg1: i32) -> (i32, i32) {
    %c0_i32 = arith.constant 0 : i32
    return %arg0, %arg1 : i32, i32
  }
  func.func @transform_1(%arg0: i32, %arg1: i32) -> (i32, i32) {
    %c0_i32 = arith.constant 0 : i32
    %c0_i32_0 = arith.constant 0 : i32
    return %arg1, %c0_i32 : i32, i32
  }
  func.func @transform_2(%arg0: i32, %arg1: i32) -> (i32, i32) {
    %c0_i32 = arith.constant 0 : i32
    %c0_i32_0 = arith.constant 0 : i32
    %c0_i32_1 = arith.constant 0 : i32
    return %c0_i32, %c0_i32_0 : i32, i32
  }
  func.func @transform_3(%arg0: i32, %arg1: i32) -> (i32, i32) {
    %c0_i32 = arith.constant 0 : i32
    %c0_i32_0 = arith.constant 0 : i32
    return %arg0, %c0_i32 : i32, i32
  }
}

</mosaic_0001>

<bundles_post_ra>
// kernel: tpu_custom_call.1
= control target key start
LH: loop header
LB: loop body
LE: loop exit
PB: predicated region body
PF: predicated region fallthrough
CT: control target
= control target key end

     0   :  { %8 = vsyncpa [#allocation4], 0  ;;  %s390_s0 = inlined_call_operand.hbm [shape: bf16[8,128], index: 0, kind: input, shape index: {}]   ;;  %s391_s1 = inlined_call_operand.hbm [shape: bf16[128,128], index: 1, kind: input, shape index: {}]   ;;  %s392_s2 = inlined_call_operand.vmem [shape: f32[1,128], index: 2, kind: input, shape index: {}]   ;;  %s393_s3 = inlined_call_operand.hbm [shape: f32[8,128], index: 3, kind: output, shape index: {}]  }
   0x1   :  { %9 = vsyncpa [#allocation7], 0 }
   0x2   :  { %10 = vsyncpa [#allocation5], 0  ;;  %s317_s12 = smov [#allocation3]   ;;  %s318_s14 = smov [#allocation6]  }
   0x3   :  { %s17_s13 = sshll.u32 %s317_s12, 4  ;;  %s26_s15 = sshll.u32 %s318_s14, 4  ;;  %s18_s13 = int_to_ptr.vmem [resolvable:$true] %s17_s13  ;;  %s344_s15 = int_to_ptr.vmem [resolvable:$true] %s26_s15 }
   0x4   :  { %s245_s18 = scalar_lea.hbm %s390_s0, 64 }
   0x5   :  { %p246_p0 = scmp.ne.s32.totalorder %s390_s0, %s245_s18  ;;  %p249_p1 = scmp.lt.u32.totalorder %s245_s18, %s390_s0 }
   0x7   :  { %p251_p2 = pnand %p249_p1, %p246_p0 }
   0x9   :  { %254 = shalt.err (!%p251_p2)
}
   0xa   :  { %s255_s23 = scalar_lea.vmem %s18_s13, 64  ;;  %p260_p4 = scmp.lt.s32.totalorder %s18_s13, %s18_s13 }
   0xb   :  { %p256_p3 = scmp.ne.s32.totalorder %s18_s13, %s255_s23  ;;  %p261_p5 = scmp.lt.s32.totalorder %s255_s23, %s255_s23 }
   0xd   :  { %p262_p6 = por %p261_p5, %p260_p4 }
   0xf   :  { %p263_p7 = pnand %p262_p6, %p256_p3 }
  0x11   :  { %266 = shalt.err (!%p263_p7)
}
  0x12   :  { %20 = dma.hbm_to_vmem [thread:$0]  %s390_s0, 64, %s18_s13, [#allocation4]  }
  0x13   :  { %s267_s28 = scalar_lea.hbm %s391_s1, 1024 }
  0x14   :  { %p268_p8 = scmp.ne.s32.totalorder %s391_s1, %s267_s28  ;;  %p271_p9 = scmp.lt.u32.totalorder %s267_s28, %s391_s1 }
  0x16   :  { %p273_p10 = pnand %p271_p9, %p268_p8 }
  0x18   :  { %276 = shalt.err (!%p273_p10)
}
  0x19   :  { %s277_s6 = scalar_lea.vmem %s344_s15, 1024  ;;  %p282_p12 = scmp.lt.s32.totalorder %s344_s15, %s344_s15 }
  0x1a   :  { %p278_p11 = scmp.ne.s32.totalorder %s344_s15, %s277_s6  ;;  %p283_p13 = scmp.lt.s32.totalorder %s277_s6, %s277_s6 }
  0x1c   :  { %p284_p0 = por %p283_p13, %p282_p12 }
  0x1e   :  { %p285_p1 = pnand %p284_p0, %p278_p11 }
  0x20   :  { %288 = shalt.err (!%p285_p1)
}
  0x21   :  { %s319_s0 = smov 64   ;;  %s320_s7 = smov 4  }
  0x22   :  { %32 = dma.hbm_to_vmem [thread:$0]  %s391_s1, 1024, %s344_s15, [#allocation7], %s319_s0, %s319_s0, %s320_s7  }
  0x23   :  { %311 = dma.done.wait [#allocation4], 64  }
  0x24   :  { %312 = vsyncadd [#allocation4], 4294967232 }
  0x25   :  { %313 = dma.done.wait [#allocation7], 1024  }
  0x26   :  { %314 = vsyncadd [#allocation7], 4294966272  ;;  %v321_v0 = vmov 0.0   ;;  %vm322_vm0 = vmmov 0   ;;  %v235_v1 = vld [vmem:[#allocation6] sm:$0xff]   ;;  %v236_v2 = vld [vmem:[#allocation6 + $0x8] sm:$0xff]  }
  0x27   :  { %208 = vmatprep.subr.bf16.mxu0 %v321_v0  ;;  %224 = vmatprep.mubr.msk.bf16.mxu0 %vm322_vm0, %v321_v0  ;;  %v237_v3 = vld [vmem:[#allocation6 + $0x10] sm:$0xff]   ;;  %v238_v4 = vld [vmem:[#allocation6 + $0x18] sm:$0xff]   ;;  %v239_v5 = vld [vmem:[#allocation6 + $0x20] sm:$0xff]   ;;  %s323_s11 = smov [#allocation8]  }
  0x28   :  { %209 = vmatpush3.bf16.msra.mxu0 %v235_v1  ;;  %v240_v6 = vld [vmem:[#allocation6 + $0x28] sm:$0xff]   ;;  %v241_v7 = vld [vmem:[#allocation6 + $0x30] sm:$0xff]   ;;  %v242_v8 = vld [vmem:[#allocation6 + $0x38] sm:$0xff]   ;;  %s180_s12 = sshll.u32 %s323_s11, 4  ;;  %s181_s12 = int_to_ptr.vmem [resolvable:$true] %s180_s12 }
  0x29   :  { %210 = vmatprep.subr.bf16.mxu0 %v321_v0  ;;  %v48_v9 = vld [vmem:[#allocation3] sm:$0xf]  ;;  %s289_s13 = scalar_lea.vmem %s181_s12, 128  ;;  %p294_p3 = scmp.lt.s32.totalorder %s181_s12, %s181_s12 }
  0x2a   :  { %v198_v10 = vld [vmem:[%s392_s2] ss:$0 sm:$0xff]  ;;  %p290_p2 = scmp.ne.s32.totalorder %s181_s12, %s289_s13  ;;  %p295_p4 = scmp.lt.s32.totalorder %s289_s13, %s289_s13 }
  0x2c   :  { %211 = vmatpush3.bf16.msra.mxu0 %v236_v2  ;;  %p296_p5 = por %p295_p4, %p294_p3 }
  0x2d   :  { %212 = vmatprep.subr.bf16.mxu0 %v321_v0 }
  0x2e   :  { %p297_p6 = pnand %p296_p5, %p290_p2 }
  0x30   :  { %213 = vmatpush3.bf16.msra.mxu0 %v237_v3 }
  0x31   :  { %214 = vmatprep.subr.bf16.mxu0 %v321_v0 }
  0x34   :  { %215 = vmatpush3.bf16.msra.mxu0 %v238_v4 }
  0x35   :  { %216 = vmatprep.subr.bf16.mxu0 %v321_v0 }
  0x38   :  { %217 = vmatpush3.bf16.msra.mxu0 %v239_v5 }
  0x39   :  { %218 = vmatprep.subr.bf16.mxu0 %v321_v0 }
  0x3c   :  { %219 = vmatpush3.bf16.msra.mxu0 %v240_v6 }
  0x3d   :  { %220 = vmatprep.subr.bf16.mxu0 %v321_v0 }
  0x40   :  { %221 = vmatpush3.bf16.msra.mxu0 %v241_v7 }
  0x41   :  { %222 = vmatprep.subr.bf16.mxu0 %v321_v0 }
  0x44   :  { %223 = vmatpush3.bf16.msra.mxu0 %v242_v8 }
  0x47   :  { %225 = vmatmul.mubr.bf16.vlgmr.msra.gmra.mrb[0].mxu0 %v48_v9 }
 0x11a   :  { %v147_v11 = vpop.f32.mrb[0].mxu0 }
 0x11b   :  { %v166_v12 = vadd.f32 %v198_v10, %v147_v11  ;;  %v226_v13 = vpop.f32.mrb[1].mxu0 }
 0x11c   :  { %v150_v14 = vpop.f32.mrb[2].mxu0 }
 0x11d   :  { %v227_v15 = vpop.f32.mrb[3].mxu0  ;;  %v167_v16 = vmul.f32 %v166_v12, %v166_v12 }
 0x11f   :  { %168 = vadd.xlane.f32.xlu0 %v167_v16 }
 0x1ac   :  { %v169_v17 = vpop.xlane.xlu0 %168 }
 0x1ad   :  { %v170_v18 = vadd.f32 1e-12, %v169_v17 }
 0x1af   :  { %243 = vrsqrt.f32 %v170_v18 }
 0x1b9   :  { %v244_v19 = vpop.eup %243 }
 0x1ba   :  { %v172_v20 = vmul.f32 %v244_v19, %v166_v12 }
 0x1bc   :  { %173 = vst [vmem:[#allocation8] sm:$0xff] %v172_v20 }
 0x1bd   :  { %300 = shalt.err (!%p297_p6)
}
 0x1be   :  { %s301_s15 = scalar_lea.hbm %s393_s3, 128 }
 0x1bf   :  { %p302_p7 = scmp.ne.s32.totalorder %s393_s3, %s301_s15  ;;  %p305_p8 = scmp.lt.u32.totalorder %s301_s15, %s393_s3 }
 0x1c1   :  { %p307_p9 = pnand %p305_p8, %p302_p7 }
 0x1c3   :  { %310 = shalt.err (!%p307_p9)
}
 0x1c4   :  { %183 = dma.vmem_to_hbm [thread:$0]  %s181_s12, 128, %s393_s3, [#allocation5]  }
 0x1c5   :  { %315 = dma.done.wait [#allocation5], 128  }
 0x1c6   :  { %316 = vsyncadd [#allocation5], 4294967168 }
 0x1c7   :  { %187 = vsyncpa [#allocation4], 1 }
 0x1c8   :  { %188 = vsyncpa [#allocation7], 1 }
 0x1c9   :  { %189 = vsyncpa [#allocation5], 1 }

</bundles_post_ra>
